<compile_context>
chip_gen: v7x
topology: tpu7x:2x2x1
jax: 0.10.0
libtpu: 0.0.40
codegen_flags: <defaults>
</compile_context>

<pallas_src>
import math
import functools

import jax
import jax.numpy as jnp
from jax.experimental import pallas as pl
from jax.experimental.pallas import tpu as pltpu  # noqa: F401  (TPU backend)


def _attn_block_kernel(x_ref, wqkv_ref, lnb_ref, w1_ref, w2_ref, o_ref,
                       *, batch, seq, num_heads, eps=1e-5):
    rows, E = x_ref.shape                      # rows = batch * seq
    hd = E // num_heads
    H = w1_ref.shape[-1]
    inv_sqrt2 = 1.0 / math.sqrt(2.0)

    x = x_ref[...]                             # (B*S, E) f32

    ln1w = lnb_ref[0:1, :]
    ln1b = lnb_ref[1:2, :]
    ln2w = lnb_ref[2:3, :]
    ln2b = lnb_ref[3:4, :]
    bo = lnb_ref[4:5, :]                       # out_proj bias

    # ---------------- LayerNorm 1 ----------------
    mu = jnp.mean(x, axis=-1, keepdims=True)
    var = jnp.mean(jnp.square(x - mu), axis=-1, keepdims=True)
    inp = (x - mu) * jax.lax.rsqrt(var + eps) * ln1w + ln1b

    # ---- Packed projection: one lane-dense MXU push for Q, K and V@Wo ----
    # column layout: [ Q (scaled) | K | Vo_0 | Vo_1 | ... | Vo_{nh-1} ]
    w_pack = wqkv_ref[0:E, :]                  # (E, 2E + nh*E)
    b_pack = wqkv_ref[E:E + 1, :]              # (1, 2E + nh*E)
    qkv = jnp.dot(inp, w_pack, preferred_element_type=jnp.float32) + b_pack

    # ---- Per-head attention; batch handled inside the kernel (no grid) ----
    attn = jnp.zeros((batch, seq, E), jnp.float32)
    for h in range(num_heads):                 # tiny nh -> unrolled at trace time
        q_h = qkv[:, h * hd:(h + 1) * hd].reshape(batch, seq, hd)
        k_h = qkv[:, E + h * hd:E + (h + 1) * hd].reshape(batch, seq, hd)
        vo_h = qkv[:, 2 * E + h * E:2 * E + (h + 1) * E].reshape(batch, seq, E)

        sc = jnp.einsum('bqd,bkd->bqk', q_h, k_h,
                        preferred_element_type=jnp.float32)      # (B, S, S)
        sc = sc - jnp.max(sc, axis=-1, keepdims=True)
        p = jnp.exp(sc)
        # exact reciprocal keeps the 1e-5 check; switch approx=True if relaxed
        p = p * pl.reciprocal(jnp.sum(p, axis=-1, keepdims=True), approx=False)

        # out_proj already folded into vo_h -> lane-dense (B, S, E) output
        attn = attn + jnp.einsum('bqk,bke->bqe', p, vo_h,
                                 preferred_element_type=jnp.float32)

    x1 = x + attn.reshape(rows, E) + bo        # residual 1 (+ out_proj bias)

    # ---------------- LayerNorm 2 + MLP ----------------
    mu2 = jnp.mean(x1, axis=-1, keepdims=True)
    var2 = jnp.mean(jnp.square(x1 - mu2), axis=-1, keepdims=True)
    y = (x1 - mu2) * jax.lax.rsqrt(var2 + eps) * ln2w + ln2b

    w1 = w1_ref[0:E, :]                        # (E, H)
    b1 = w1_ref[E:E + 1, :]                    # (1, H)
    h1 = jnp.dot(y, w1, preferred_element_type=jnp.float32) + b1
    h1 = 0.5 * h1 * (1.0 + jax.lax.erf(h1 * inv_sqrt2))          # exact GELU

    w2 = w2_ref[0:H, :]                        # (H, E)
    b2 = w2_ref[H:H + 1, :]                    # (1, E)
    h2 = jnp.dot(h1, w2, preferred_element_type=jnp.float32) + b2

    o_ref[...] = (x1 + h2).astype(o_ref.dtype)  # residual 2


def _prep_params(params, num_heads):
    """Host-side one-time weight re-layout (PyTorch -> packed MXU-friendly slabs)."""
    f32 = jnp.float32
    E = params["ln1_w"].shape[0]
    hd = E // num_heads
    scale = 1.0 / math.sqrt(hd)

    in_w = params["in_proj_w"].astype(f32)      # (3E, E) PyTorch (out, in)
    in_b = params["in_proj_b"].astype(f32)      # (3E,)
    wq_t = in_w[0 * E:1 * E].T * scale          # (E, E), 1/sqrt(hd) folded in
    wk_t = in_w[1 * E:2 * E].T
    wv_t = in_w[2 * E:3 * E].T
    bq = in_b[0 * E:1 * E] * scale
    bk = in_b[1 * E:2 * E]
    bv = in_b[2 * E:3 * E]

    wo_t = params["out_proj_w"].astype(f32).T   # (E, E): applied as ctx @ wo_t
    # Fold out_proj into V per head: Wvo_h = Wv_h @ Wo_h ; bvo_h = bv_h @ Wo_h
    wvo = [wv_t[:, h * hd:(h + 1) * hd] @ wo_t[h * hd:(h + 1) * hd, :]
           for h in range(num_heads)]           # each (E, E)
    bvo = [bv[h * hd:(h + 1) * hd] @ wo_t[h * hd:(h + 1) * hd, :]
           for h in range(num_heads)]           # each (E,)

    w_pack = jnp.concatenate([wq_t, wk_t] + wvo, axis=1)     # (E, 2E + nh*E)
    b_pack = jnp.concatenate([bq, bk] + bvo, axis=0)         # (2E + nh*E,)
    wqkv_slab = jnp.concatenate([w_pack, b_pack[None, :]], axis=0)  # (E+1, .)

    lnb_slab = jnp.stack([params["ln1_w"].astype(f32),
                          params["ln1_b"].astype(f32),
                          params["ln2_w"].astype(f32),
                          params["ln2_b"].astype(f32),
                          params["out_proj_b"].astype(f32)], axis=0)  # (5, E)

    mlp1_slab = jnp.concatenate([params["fc1_w"].astype(f32).T,
                                 params["fc1_b"].astype(f32)[None, :]], axis=0)
    mlp2_slab = jnp.concatenate([params["fc2_w"].astype(f32).T,
                                 params["fc2_b"].astype(f32)[None, :]], axis=0)

    return wqkv_slab, lnb_slab, mlp1_slab, mlp2_slab


def attention_block_forward(x_sbe, params, num_heads):
    """x_sbe: (S, B, E) float32, PyTorch (seq, batch, embed) convention."""
    S, B, E = x_sbe.shape
    # Batch folded into the row (sublane) axis -> one kernel invocation, no grid.
    x = jnp.transpose(x_sbe, (1, 0, 2)).reshape(B * S, E).astype(jnp.float32)

    wqkv, lnb, mlp1, mlp2 = _prep_params(params, num_heads)

    kernel = functools.partial(_attn_block_kernel,
                               batch=B, seq=S, num_heads=num_heads)
    out = pl.pallas_call(
        kernel,
        out_shape=jax.ShapeDtypeStruct((B * S, E), jnp.float32),
        # No grid, no explicit specs: every operand is a full-array VMEM block.
    )(x, wqkv, lnb, mlp1, mlp2)

    return jnp.transpose(out.reshape(B, S, E), (1, 0, 2))     # back to (S, B, E)


def attention_block_reference(x_sbe, params, num_heads):
    """Pure-JAX reference with PyTorch-identical math, for correctness checking."""
    x = jnp.transpose(x_sbe, (1, 0, 2))
    B, S, E = x.shape
    hd = E // num_heads

    def ln(a, w, b, eps=1e-5):
        mu = a.mean(-1, keepdims=True)
        var = ((a - mu) ** 2).mean(-1, keepdims=True)
        return (a - mu) / jnp.sqrt(var + eps) * w + b

    inp = ln(x, params["ln1_w"], params["ln1_b"])
    qkv = inp @ params["in_proj_w"].T + params["in_proj_b"]
    q, k, v = qkv[..., :E], qkv[..., E:2 * E], qkv[..., 2 * E:]
    qh = q.reshape(B, S, num_heads, hd).transpose(0, 2, 1, 3) / math.sqrt(hd)
    kh = k.reshape(B, S, num_heads, hd).transpose(0, 2, 1, 3)
    vh = v.reshape(B, S, num_heads, hd).transpose(0, 2, 1, 3)
    p = jax.nn.softmax(jnp.einsum("bhqd,bhkd->bhqk", qh, kh), axis=-1)
    a = jnp.einsum("bhqk,bhkd->bhqd", p, vh).transpose(0, 2, 1, 3).reshape(B, S, E)
    a = a @ params["out_proj_w"].T + params["out_proj_b"]
    x1 = x + a
    y = ln(x1, params["ln2_w"], params["ln2_b"])
    h1 = y @ params["fc1_w"].T + params["fc1_b"]
    h1 = 0.5 * h1 * (1.0 + jax.lax.erf(h1 / math.sqrt(2.0)))
    h2 = h1 @ params["fc2_w"].T + params["fc2_b"]
    return jnp.transpose(x1 + h2, (1, 0, 2))


if __name__ == "__main__":
    # Small shapes: seq=8, batch=2, embed_dim=32, hidden_dim=64, num_heads=4
    S, B, E, H, NUM_HEADS = 8, 2, 32, 64, 4

    key = jax.random.PRNGKey(0)
    keys = jax.random.split(key, 10)

    def init(k, shape, scale=0.1):
        return (scale * jax.random.normal(k, shape)).astype(jnp.float32)

    params = {
        "ln1_w": jnp.ones((E,), jnp.float32),
        "ln1_b": jnp.zeros((E,), jnp.float32),
        "in_proj_w": init(keys[0], (3 * E, E)),
        "in_proj_b": init(keys[1], (3 * E,)),
        "out_proj_w": init(keys[2], (E, E)),
        "out_proj_b": init(keys[3], (E,)),
        "ln2_w": jnp.ones((E,), jnp.float32),
        "ln2_b": jnp.zeros((E,), jnp.float32),
        "fc1_w": init(keys[4], (H, E)),
        "fc1_b": init(keys[5], (H,)),
        "fc2_w": init(keys[6], (E, H)),
        "fc2_b": init(keys[7], (E,)),
    }

    x = jax.random.normal(keys[8], (S, B, E), dtype=jnp.float32)

    out = attention_block_forward(x, params, NUM_HEADS)
    out = jax.block_until_ready(out)

    ref = attention_block_reference(x, params, NUM_HEADS)
    assert out.shape == (S, B, E)
    assert jnp.allclose(out, ref, atol=1e-5, rtol=1e-5), "mismatch vs reference"

    print("KERNEL_OK")
</pallas_src>

<mosaic_0001>
module attributes {stable_mosaic.version = 11 : i64} {
  func.func @_attn_block_kernel(%arg0: memref<16x32xf32, #tpu.memory_space<vmem>>, %arg1: memref<33x192xf32, #tpu.memory_space<vmem>>, %arg2: memref<5x32xf32, #tpu.memory_space<vmem>>, %arg3: memref<33x64xf32, #tpu.memory_space<vmem>>, %arg4: memref<65x32xf32, #tpu.memory_space<vmem>>, %arg5: memref<16x32xf32, #tpu.memory_space<vmem>>) attributes {dimension_semantics = [], scalar_prefetch = 0 : i64, scratch_operands = 0 : i64, tpu.core_type = #tpu.core_type<tc>} {
    %c0 = arith.constant 0 : index
    %c0_0 = arith.constant 0 : index
    %0 = vector.load %arg0[%c0, %c0_0] : memref<16x32xf32, #tpu.memory_space<vmem>>, vector<16x32xf32>
    %c0_1 = arith.constant 0 : index
    %c0_2 = arith.constant 0 : index
    %1 = vector.load %arg2[%c0_1, %c0_2] : memref<5x32xf32, #tpu.memory_space<vmem>>, vector<1x32xf32>
    %c1 = arith.constant 1 : index
    %c0_3 = arith.constant 0 : index
    %2 = vector.load %arg2[%c1, %c0_3] : memref<5x32xf32, #tpu.memory_space<vmem>>, vector<1x32xf32>
    %c2 = arith.constant 2 : index
    %c0_4 = arith.constant 0 : index
    %3 = vector.load %arg2[%c2, %c0_4] : memref<5x32xf32, #tpu.memory_space<vmem>>, vector<1x32xf32>
    %c3 = arith.constant 3 : index
    %c0_5 = arith.constant 0 : index
    %4 = vector.load %arg2[%c3, %c0_5] : memref<5x32xf32, #tpu.memory_space<vmem>>, vector<1x32xf32>
    %c4 = arith.constant 4 : index
    %c0_6 = arith.constant 0 : index
    %5 = vector.load %arg2[%c4, %c0_6] : memref<5x32xf32, #tpu.memory_space<vmem>>, vector<1x32xf32>
    %cst = arith.constant dense<0.000000e+00> : vector<16xf32>
    %6 = vector.multi_reduction <add>, %0, %cst [1] : vector<16x32xf32> to vector<16xf32>
    %7 = vector.shape_cast %6 : vector<16xf32> to vector<16x1xf32>
    %cst_7 = arith.constant 3.200000e+01 : f32
    %8 = vector.broadcast %cst_7 : f32 to vector<16x1xf32>
    %9 = arith.divf %7, %8 : vector<16x1xf32>
    %10 = vector.broadcast %9 : vector<16x1xf32> to vector<16x32xf32>
    %11 = arith.subf %0, %10 : vector<16x32xf32>
    %12 = arith.mulf %11, %11 : vector<16x32xf32>
    %cst_8 = arith.constant dense<0.000000e+00> : vector<16xf32>
    %13 = vector.multi_reduction <add>, %12, %cst_8 [1] : vector<16x32xf32> to vector<16xf32>
    %14 = vector.shape_cast %13 : vector<16xf32> to vector<16x1xf32>
    %cst_9 = arith.constant 3.200000e+01 : f32
    %15 = vector.broadcast %cst_9 : f32 to vector<16x1xf32>
    %16 = arith.divf %14, %15 : vector<16x1xf32>
    %17 = vector.broadcast %9 : vector<16x1xf32> to vector<16x32xf32>
    %18 = arith.subf %0, %17 : vector<16x32xf32>
    %cst_10 = arith.constant 9.99999974E-6 : f32
    %19 = vector.broadcast %cst_10 : f32 to vector<16x1xf32>
    %20 = arith.addf %16, %19 : vector<16x1xf32>
    %21 = math.rsqrt %20 : vector<16x1xf32>
    %22 = vector.broadcast %21 : vector<16x1xf32> to vector<16x32xf32>
    %23 = arith.mulf %18, %22 : vector<16x32xf32>
    %24 = vector.broadcast %1 : vector<1x32xf32> to vector<16x32xf32>
    %25 = arith.mulf %23, %24 : vector<16x32xf32>
    %26 = vector.broadcast %2 : vector<1x32xf32> to vector<16x32xf32>
    %27 = arith.addf %25, %26 : vector<16x32xf32>
    %c0_11 = arith.constant 0 : index
    %c0_12 = arith.constant 0 : index
    %28 = vector.load %arg1[%c0_11, %c0_12] : memref<33x192xf32, #tpu.memory_space<vmem>>, vector<32x192xf32>
    %c32 = arith.constant 32 : index
    %c0_13 = arith.constant 0 : index
    %29 = vector.load %arg1[%c32, %c0_13] : memref<33x192xf32, #tpu.memory_space<vmem>>, vector<1x192xf32>
    %cst_14 = arith.constant dense<0.000000e+00> : vector<16x192xf32>
    %30 = tpu.matmul %27, %28, %cst_14 {dimension_numbers = #tpu.dot_dimension_numbers<[1], [0], [0], [1], [0, 0, 1, 1], [], []>} : vector<16x32xf32>, vector<32x192xf32>, vector<16x192xf32> -> vector<16x192xf32>
    %31 = vector.broadcast %29 : vector<1x192xf32> to vector<16x192xf32>
    %32 = arith.addf %30, %31 : vector<16x192xf32>
    %cst_15 = arith.constant 0.000000e+00 : f32
    %33 = vector.broadcast %cst_15 : f32 to vector<2x8x32xf32>
    %34 = vector.extract_strided_slice %32 {offsets = [0, 0], sizes = [16, 8], strides = [1, 1]} : vector<16x192xf32> to vector<16x8xf32>
    %35 = vector.shape_cast %34 : vector<16x8xf32> to vector<2x8x8xf32>
    %36 = vector.extract_strided_slice %32 {offsets = [0, 32], sizes = [16, 8], strides = [1, 1]} : vector<16x192xf32> to vector<16x8xf32>
    %37 = vector.shape_cast %36 : vector<16x8xf32> to vector<2x8x8xf32>
    %38 = vector.extract_strided_slice %32 {offsets = [0, 64], sizes = [16, 32], strides = [1, 1]} : vector<16x192xf32> to vector<16x32xf32>
    %39 = vector.shape_cast %38 : vector<16x32xf32> to vector<2x8x32xf32>
    "tpu.trace_start"() <{level = 10 : i32, message = "bqd,bkd->bqk"}> : () -> ()
    %cst_16 = arith.constant dense<0.000000e+00> : vector<2x8x8xf32>
    %40 = tpu.matmul %35, %37, %cst_16 {dimension_numbers = #tpu.dot_dimension_numbers<[2], [2], [1], [1], [0, 0, 0, 1, 1, 1], [0], [0]>} : vector<2x8x8xf32>, vector<2x8x8xf32>, vector<2x8x8xf32> -> vector<2x8x8xf32>
    "tpu.trace_stop"() : () -> ()
    %cst_17 = arith.constant dense<0xFF800000> : vector<2x8xf32>
    %41 = vector.multi_reduction <maximumf>, %40, %cst_17 [2] : vector<2x8x8xf32> to vector<2x8xf32>
    %42 = vector.shape_cast %41 : vector<2x8xf32> to vector<2x8x1xf32>
    %43 = vector.broadcast %42 : vector<2x8x1xf32> to vector<2x8x8xf32>
    %44 = arith.subf %40, %43 : vector<2x8x8xf32>
    %45 = math.exp %44 : vector<2x8x8xf32>
    %cst_18 = arith.constant dense<0.000000e+00> : vector<2x8xf32>
    %46 = vector.multi_reduction <add>, %45, %cst_18 [2] : vector<2x8x8xf32> to vector<2x8xf32>
    %47 = vector.shape_cast %46 : vector<2x8xf32> to vector<2x8x1xf32>
    %48 = tpu.reciprocal %47 : vector<2x8x1xf32> -> vector<2x8x1xf32>
    %49 = vector.broadcast %48 : vector<2x8x1xf32> to vector<2x8x8xf32>
    %50 = arith.mulf %45, %49 : vector<2x8x8xf32>
    "tpu.trace_start"() <{level = 10 : i32, message = "bqk,bke->bqe"}> : () -> ()
    %cst_19 = arith.constant dense<0.000000e+00> : vector<2x8x32xf32>
    %51 = tpu.matmul %50, %39, %cst_19 {dimension_numbers = #tpu.dot_dimension_numbers<[2], [1], [1], [2], [0, 0, 0, 1, 1, 2], [0], [0]>} : vector<2x8x8xf32>, vector<2x8x32xf32>, vector<2x8x32xf32> -> vector<2x8x32xf32>
    "tpu.trace_stop"() : () -> ()
    %52 = arith.addf %33, %51 : vector<2x8x32xf32>
    %53 = vector.extract_strided_slice %32 {offsets = [0, 8], sizes = [16, 8], strides = [1, 1]} : vector<16x192xf32> to vector<16x8xf32>
    %54 = vector.shape_cast %53 : vector<16x8xf32> to vector<2x8x8xf32>
    %55 = vector.extract_strided_slice %32 {offsets = [0, 40], sizes = [16, 8], strides = [1, 1]} : vector<16x192xf32> to vector<16x8xf32>
    %56 = vector.shape_cast %55 : vector<16x8xf32> to vector<2x8x8xf32>
    %57 = vector.extract_strided_slice %32 {offsets = [0, 96], sizes = [16, 32], strides = [1, 1]} : vector<16x192xf32> to vector<16x32xf32>
    %58 = vector.shape_cast %57 : vector<16x32xf32> to vector<2x8x32xf32>
    "tpu.trace_start"() <{level = 10 : i32, message = "bqd,bkd->bqk"}> : () -> ()
    %cst_20 = arith.constant dense<0.000000e+00> : vector<2x8x8xf32>
    %59 = tpu.matmul %54, %56, %cst_20 {dimension_numbers = #tpu.dot_dimension_numbers<[2], [2], [1], [1], [0, 0, 0, 1, 1, 1], [0], [0]>} : vector<2x8x8xf32>, vector<2x8x8xf32>, vector<2x8x8xf32> -> vector<2x8x8xf32>
    "tpu.trace_stop"() : () -> ()
    %cst_21 = arith.constant dense<0xFF800000> : vector<2x8xf32>
    %60 = vector.multi_reduction <maximumf>, %59, %cst_21 [2] : vector<2x8x8xf32> to vector<2x8xf32>
    %61 = vector.shape_cast %60 : vector<2x8xf32> to vector<2x8x1xf32>
    %62 = vector.broadcast %61 : vector<2x8x1xf32> to vector<2x8x8xf32>
    %63 = arith.subf %59, %62 : vector<2x8x8xf32>
    %64 = math.exp %63 : vector<2x8x8xf32>
    %cst_22 = arith.constant dense<0.000000e+00> : vector<2x8xf32>
    %65 = vector.multi_reduction <add>, %64, %cst_22 [2] : vector<2x8x8xf32> to vector<2x8xf32>
    %66 = vector.shape_cast %65 : vector<2x8xf32> to vector<2x8x1xf32>
    %67 = tpu.reciprocal %66 : vector<2x8x1xf32> -> vector<2x8x1xf32>
    %68 = vector.broadcast %67 : vector<2x8x1xf32> to vector<2x8x8xf32>
    %69 = arith.mulf %64, %68 : vector<2x8x8xf32>
    "tpu.trace_start"() <{level = 10 : i32, message = "bqk,bke->bqe"}> : () -> ()
    %cst_23 = arith.constant dense<0.000000e+00> : vector<2x8x32xf32>
    %70 = tpu.matmul %69, %58, %cst_23 {dimension_numbers = #tpu.dot_dimension_numbers<[2], [1], [1], [2], [0, 0, 0, 1, 1, 2], [0], [0]>} : vector<2x8x8xf32>, vector<2x8x32xf32>, vector<2x8x32xf32> -> vector<2x8x32xf32>
    "tpu.trace_stop"() : () -> ()
    %71 = arith.addf %52, %70 : vector<2x8x32xf32>
    %72 = vector.extract_strided_slice %32 {offsets = [0, 16], sizes = [16, 8], strides = [1, 1]} : vector<16x192xf32> to vector<16x8xf32>
    %73 = vector.shape_cast %72 : vector<16x8xf32> to vector<2x8x8xf32>
    %74 = vector.extract_strided_slice %32 {offsets = [0, 48], sizes = [16, 8], strides = [1, 1]} : vector<16x192xf32> to vector<16x8xf32>
    %75 = vector.shape_cast %74 : vector<16x8xf32> to vector<2x8x8xf32>
    %76 = vector.extract_strided_slice %32 {offsets = [0, 128], sizes = [16, 32], strides = [1, 1]} : vector<16x192xf32> to vector<16x32xf32>
    %77 = vector.shape_cast %76 : vector<16x32xf32> to vector<2x8x32xf32>
    "tpu.trace_start"() <{level = 10 : i32, message = "bqd,bkd->bqk"}> : () -> ()
    %cst_24 = arith.constant dense<0.000000e+00> : vector<2x8x8xf32>
    %78 = tpu.matmul %73, %75, %cst_24 {dimension_numbers = #tpu.dot_dimension_numbers<[2], [2], [1], [1], [0, 0, 0, 1, 1, 1], [0], [0]>} : vector<2x8x8xf32>, vector<2x8x8xf32>, vector<2x8x8xf32> -> vector<2x8x8xf32>
    "tpu.trace_stop"() : () -> ()
    %cst_25 = arith.constant dense<0xFF800000> : vector<2x8xf32>
    %79 = vector.multi_reduction <maximumf>, %78, %cst_25 [2] : vector<2x8x8xf32> to vector<2x8xf32>
    %80 = vector.shape_cast %79 : vector<2x8xf32> to vector<2x8x1xf32>
    %81 = vector.broadcast %80 : vector<2x8x1xf32> to vector<2x8x8xf32>
    %82 = arith.subf %78, %81 : vector<2x8x8xf32>
    %83 = math.exp %82 : vector<2x8x8xf32>
    %cst_26 = arith.constant dense<0.000000e+00> : vector<2x8xf32>
    %84 = vector.multi_reduction <add>, %83, %cst_26 [2] : vector<2x8x8xf32> to vector<2x8xf32>
    %85 = vector.shape_cast %84 : vector<2x8xf32> to vector<2x8x1xf32>
    %86 = tpu.reciprocal %85 : vector<2x8x1xf32> -> vector<2x8x1xf32>
    %87 = vector.broadcast %86 : vector<2x8x1xf32> to vector<2x8x8xf32>
    %88 = arith.mulf %83, %87 : vector<2x8x8xf32>
    "tpu.trace_start"() <{level = 10 : i32, message = "bqk,bke->bqe"}> : () -> ()
    %cst_27 = arith.constant dense<0.000000e+00> : vector<2x8x32xf32>
    %89 = tpu.matmul %88, %77, %cst_27 {dimension_numbers = #tpu.dot_dimension_numbers<[2], [1], [1], [2], [0, 0, 0, 1, 1, 2], [0], [0]>} : vector<2x8x8xf32>, vector<2x8x32xf32>, vector<2x8x32xf32> -> vector<2x8x32xf32>
    "tpu.trace_stop"() : () -> ()
    %90 = arith.addf %71, %89 : vector<2x8x32xf32>
    %91 = vector.extract_strided_slice %32 {offsets = [0, 24], sizes = [16, 8], strides = [1, 1]} : vector<16x192xf32> to vector<16x8xf32>
    %92 = vector.shape_cast %91 : vector<16x8xf32> to vector<2x8x8xf32>
    %93 = vector.extract_strided_slice %32 {offsets = [0, 56], sizes = [16, 8], strides = [1, 1]} : vector<16x192xf32> to vector<16x8xf32>
    %94 = vector.shape_cast %93 : vector<16x8xf32> to vector<2x8x8xf32>
    %95 = vector.extract_strided_slice %32 {offsets = [0, 160], sizes = [16, 32], strides = [1, 1]} : vector<16x192xf32> to vector<16x32xf32>
    %96 = vector.shape_cast %95 : vector<16x32xf32> to vector<2x8x32xf32>
    "tpu.trace_start"() <{level = 10 : i32, message = "bqd,bkd->bqk"}> : () -> ()
    %cst_28 = arith.constant dense<0.000000e+00> : vector<2x8x8xf32>
    %97 = tpu.matmul %92, %94, %cst_28 {dimension_numbers = #tpu.dot_dimension_numbers<[2], [2], [1], [1], [0, 0, 0, 1, 1, 1], [0], [0]>} : vector<2x8x8xf32>, vector<2x8x8xf32>, vector<2x8x8xf32> -> vector<2x8x8xf32>
    "tpu.trace_stop"() : () -> ()
    %cst_29 = arith.constant dense<0xFF800000> : vector<2x8xf32>
    %98 = vector.multi_reduction <maximumf>, %97, %cst_29 [2] : vector<2x8x8xf32> to vector<2x8xf32>
    %99 = vector.shape_cast %98 : vector<2x8xf32> to vector<2x8x1xf32>
    %100 = vector.broadcast %99 : vector<2x8x1xf32> to vector<2x8x8xf32>
    %101 = arith.subf %97, %100 : vector<2x8x8xf32>
    %102 = math.exp %101 : vector<2x8x8xf32>
    %cst_30 = arith.constant dense<0.000000e+00> : vector<2x8xf32>
    %103 = vector.multi_reduction <add>, %102, %cst_30 [2] : vector<2x8x8xf32> to vector<2x8xf32>
    %104 = vector.shape_cast %103 : vector<2x8xf32> to vector<2x8x1xf32>
    %105 = tpu.reciprocal %104 : vector<2x8x1xf32> -> vector<2x8x1xf32>
    %106 = vector.broadcast %105 : vector<2x8x1xf32> to vector<2x8x8xf32>
    %107 = arith.mulf %102, %106 : vector<2x8x8xf32>
    "tpu.trace_start"() <{level = 10 : i32, message = "bqk,bke->bqe"}> : () -> ()
    %cst_31 = arith.constant dense<0.000000e+00> : vector<2x8x32xf32>
    %108 = tpu.matmul %107, %96, %cst_31 {dimension_numbers = #tpu.dot_dimension_numbers<[2], [1], [1], [2], [0, 0, 0, 1, 1, 2], [0], [0]>} : vector<2x8x8xf32>, vector<2x8x32xf32>, vector<2x8x32xf32> -> vector<2x8x32xf32>
    "tpu.trace_stop"() : () -> ()
    %109 = arith.addf %90, %108 : vector<2x8x32xf32>
    %110 = vector.shape_cast %109 : vector<2x8x32xf32> to vector<16x32xf32>
    %111 = arith.addf %0, %110 : vector<16x32xf32>
    %112 = vector.broadcast %5 : vector<1x32xf32> to vector<16x32xf32>
    %113 = arith.addf %111, %112 : vector<16x32xf32>
    %cst_32 = arith.constant dense<0.000000e+00> : vector<16xf32>
    %114 = vector.multi_reduction <add>, %113, %cst_32 [1] : vector<16x32xf32> to vector<16xf32>
    %115 = vector.shape_cast %114 : vector<16xf32> to vector<16x1xf32>
    %cst_33 = arith.constant 3.200000e+01 : f32
    %116 = vector.broadcast %cst_33 : f32 to vector<16x1xf32>
    %117 = arith.divf %115, %116 : vector<16x1xf32>
    %118 = vector.broadcast %117 : vector<16x1xf32> to vector<16x32xf32>
    %119 = arith.subf %113, %118 : vector<16x32xf32>
    %120 = arith.mulf %119, %119 : vector<16x32xf32>
    %cst_34 = arith.constant dense<0.000000e+00> : vector<16xf32>
    %121 = vector.multi_reduction <add>, %120, %cst_34 [1] : vector<16x32xf32> to vector<16xf32>
    %122 = vector.shape_cast %121 : vector<16xf32> to vector<16x1xf32>
    %cst_35 = arith.constant 3.200000e+01 : f32
    %123 = vector.broadcast %cst_35 : f32 to vector<16x1xf32>
    %124 = arith.divf %122, %123 : vector<16x1xf32>
    %125 = vector.broadcast %117 : vector<16x1xf32> to vector<16x32xf32>
    %126 = arith.subf %113, %125 : vector<16x32xf32>
    %cst_36 = arith.constant 9.99999974E-6 : f32
    %127 = vector.broadcast %cst_36 : f32 to vector<16x1xf32>
    %128 = arith.addf %124, %127 : vector<16x1xf32>
    %129 = math.rsqrt %128 : vector<16x1xf32>
    %130 = vector.broadcast %129 : vector<16x1xf32> to vector<16x32xf32>
    %131 = arith.mulf %126, %130 : vector<16x32xf32>
    %132 = vector.broadcast %3 : vector<1x32xf32> to vector<16x32xf32>
    %133 = arith.mulf %131, %132 : vector<16x32xf32>
    %134 = vector.broadcast %4 : vector<1x32xf32> to vector<16x32xf32>
    %135 = arith.addf %133, %134 : vector<16x32xf32>
    %c0_37 = arith.constant 0 : index
    %c0_38 = arith.constant 0 : index
    %136 = vector.load %arg3[%c0_37, %c0_38] : memref<33x64xf32, #tpu.memory_space<vmem>>, vector<32x64xf32>
    %c32_39 = arith.constant 32 : index
    %c0_40 = arith.constant 0 : index
    %137 = vector.load %arg3[%c32_39, %c0_40] : memref<33x64xf32, #tpu.memory_space<vmem>>, vector<1x64xf32>
    %cst_41 = arith.constant dense<0.000000e+00> : vector<16x64xf32>
    %138 = tpu.matmul %135, %136, %cst_41 {dimension_numbers = #tpu.dot_dimension_numbers<[1], [0], [0], [1], [0, 0, 1, 1], [], []>} : vector<16x32xf32>, vector<32x64xf32>, vector<16x64xf32> -> vector<16x64xf32>
    %139 = vector.broadcast %137 : vector<1x64xf32> to vector<16x64xf32>
    %140 = arith.addf %138, %139 : vector<16x64xf32>
    %cst_42 = arith.constant 5.000000e-01 : f32
    %141 = vector.broadcast %cst_42 : f32 to vector<16x64xf32>
    %142 = arith.mulf %141, %140 : vector<16x64xf32>
    %cst_43 = arith.constant 0.707106769 : f32
    %143 = vector.broadcast %cst_43 : f32 to vector<16x64xf32>
    %144 = arith.mulf %140, %143 : vector<16x64xf32>
    %145 = math.erf %144 : vector<16x64xf32>
    %cst_44 = arith.constant 1.000000e+00 : f32
    %146 = vector.broadcast %cst_44 : f32 to vector<16x64xf32>
    %147 = arith.addf %146, %145 : vector<16x64xf32>
    %148 = arith.mulf %142, %147 : vector<16x64xf32>
    %c0_45 = arith.constant 0 : index
    %c0_46 = arith.constant 0 : index
    %149 = vector.load %arg4[%c0_45, %c0_46] : memref<65x32xf32, #tpu.memory_space<vmem>>, vector<64x32xf32>
    %c64 = arith.constant 64 : index
    %c0_47 = arith.constant 0 : index
    %150 = vector.load %arg4[%c64, %c0_47] : memref<65x32xf32, #tpu.memory_space<vmem>>, vector<1x32xf32>
    %cst_48 = arith.constant dense<0.000000e+00> : vector<16x32xf32>
    %151 = tpu.matmul %148, %149, %cst_48 {dimension_numbers = #tpu.dot_dimension_numbers<[1], [0], [0], [1], [0, 0, 1, 1], [], []>} : vector<16x64xf32>, vector<64x32xf32>, vector<16x32xf32> -> vector<16x32xf32>
    %152 = vector.broadcast %150 : vector<1x32xf32> to vector<16x32xf32>
    %153 = arith.addf %151, %152 : vector<16x32xf32>
    %154 = arith.addf %113, %153 : vector<16x32xf32>
    %c0_49 = arith.constant 0 : index
    %c0_50 = arith.constant 0 : index
    %155 = vector.load %arg5[%c0_49, %c0_50] : memref<16x32xf32, #tpu.memory_space<vmem>>, vector<16x32xf32>
    tpu.vector_store %arg5[%c0_49, %c0_50], %154 {strides = array<i32>} : memref<16x32xf32, #tpu.memory_space<vmem>>, vector<16x32xf32>,
    return
  }
}

</mosaic_0001>

<bundles_post_ra>
// kernel: tpu_custom_call.1
= control target key start
LH: loop header
LB: loop body
LE: loop exit
PB: predicated region body
PF: predicated region fallthrough
CT: control target
= control target key end

     0   :  { %10 = vsyncpa [#allocation3], 0  ;;  %s2430_s0 = inlined_call_operand.vmem [shape: f32[16,32], index: 0, kind: input, shape index: {}]   ;;  %s2431_s1 = inlined_call_operand.vmem [shape: f32[33,192], index: 1, kind: input, shape index: {}]   ;;  %s2432_s2 = inlined_call_operand.vmem [shape: f32[5,32], index: 2, kind: input, shape index: {}]   ;;  %s2433_s3 = inlined_call_operand.hbm [shape: f32[33,64], index: 3, kind: input, shape index: {}]   ;;  %s2434_s4 = inlined_call_operand.vmem [shape: f32[65,32], index: 4, kind: input, shape index: {}]   ;;  %s2435_s5 = inlined_call_operand.hbm [shape: f32[16,32], index: 5, kind: output, shape index: {}]  }
   0x1   :  { %11 = vsyncpa [#allocation4], 0  ;;  %s2106_s18 = smov [#allocation2]   ;;  %s2058_s22 = scalar_lea.hbm %s2433_s3, 640 }
   0x2   :  { %s23_s19 = sshll.u32 %s2106_s18, 4  ;;  %p2059_p0 = scmp.ne.s32.totalorder %s2433_s3, %s2058_s22  ;;  %s24_s19 = int_to_ptr.vmem [resolvable:$true] %s23_s19 }
   0x3   :  { %p2062_p1 = scmp.lt.u32.totalorder %s2058_s22, %s2433_s3 }
   0x5   :  { %p2064_p2 = pnand %p2062_p1, %p2059_p0 }
   0x7   :  { %2067 = shalt.err (!%p2064_p2)
}
   0x8   :  { %s2068_s27 = scalar_lea.vmem %s24_s19, 640  ;;  %p2073_p4 = scmp.lt.s32.totalorder %s24_s19, %s24_s19 }
   0x9   :  { %p2069_p3 = scmp.ne.s32.totalorder %s24_s19, %s2068_s27  ;;  %p2074_p5 = scmp.lt.s32.totalorder %s2068_s27, %s2068_s27 }
   0xb   :  { %p2075_p6 = por %p2074_p5, %p2073_p4 }
   0xd   :  { %p2076_p7 = pnand %p2075_p6, %p2069_p3 }
   0xf   :  { %2079 = shalt.err (!%p2076_p7)
}
  0x10   :  { %s2107_s28 = smov 128   ;;  %s2108_s29 = smov 8  }
  0x11   :  { %29 = dma.hbm_to_vmem [thread:$0]  %s2433_s3, 640, %s24_s19, [#allocation3], %s2107_s28, %s2107_s28, %s2108_s29  }
  0x12   :  { %2102 = dma.done.wait [#allocation3], 640  }
  0x13   :  { %2103 = vsyncadd [#allocation3], 4294966656  ;;  %vm42_vm0 = vcmask 261120   ;;  %v2169_v0 = vld [vmem:[%s2430_s0] sm:$0xff]  ;;  %v2174_v1 = vld [vmem:[%s2430_s0 + $0x8] sm:$0xff]  ;;  %v2109_v21 = vmov 0.0   ;;  %v93_v43 = vlaneseq }
  0x14   :  { %v43_v2 = vsel %vm42_vm0, %v2169_v0, 0.0  ;;  %v46_v3 = vsel %vm42_vm0, %v2174_v1, 0.0  ;;  %v83_v14 = vld [vmem:[%s2431_s1 + $0x8] sm:$0xff]  ;;  %v85_v15 = vld [vmem:[%s2431_s1 + $0x18] sm:$0xff]  ;;  %v82_v16 = vld [vmem:[%s2431_s1] sm:$0xff]  ;;  %173 = vmatprep.mubr.f32.mxu0 %v2109_v21  ;;  %179 = vmatprep.mubr.f32.mxu1 %v2109_v21  ;;  %vm2110_vm1 = vmmov 0  }
  0x15   :  { %44 = vadd.xlane.f32.xlu0 %v43_v2  ;;  %v1963_v17 = vpack.c.bf16 %v85_v15, %v83_v14  ;;  %v84_v18 = vld [vmem:[%s2431_s1 + $0x10] sm:$0xff]  ;;  %v87_v19 = vld [vmem:[%s2431_s1 + $0x28] sm:$0xff]  ;;  %v89_v20 = vld [vmem:[%s2431_s1 + $0x38] sm:$0xff]  ;;  %v2220_v44 = vshrl.u32 %v93_v43, 7  ;;  %s2111_s8 = smov 96   ;;  %s2112_s9 = smov 120  }
  0x16   :  { %v1965_v22 = vpack.c.bf16 %v84_v18, %v82_v16  ;;  %v1967_v23 = vpack.c.bf16 %v89_v20, %v87_v19  ;;  %v86_v24 = vld [vmem:[%s2431_s1 + $0x20] sm:$0xff]  ;;  %v88_v25 = vld [vmem:[%s2431_s1 + $0x30] sm:$0xff]  ;;  %vm189_vm2 = vcmask 64512   ;;  %s2114_s10 = smov 32   ;;  %s2115_s0 = smov 64   ;;  %vm1664_vm3 = vcmask 523264  }
  0x17   :  { %1964 = vmatprep.subr.bf16.mxu0 %v1963_v17  ;;  %1995 = vmatprep.subr.bf16.mxu1 %v1963_v17  ;;  %v1969_v26 = vpack.c.bf16 %v88_v25, %v86_v24  ;;  %v1767_v34 = vld [vmem:[%s2432_s2] ss:$0 sm:$0xff]  ;;  %v1768_v36 = vld [vmem:[%s2432_s2 + $0x1] ss:$0 sm:$0xff]  ;;  %v95_v45 = vsub.s32 0, %v2220_v44  ;;  %s2116_s3 = smov 80  }
  0x18   :  { %1966 = vmatpush1.bf16.msra.mxu0 %v1965_v22  ;;  %1997 = vmatpush1.bf16.msra.mxu1 %v1965_v22  ;;  %v2230_v46 = vld [vmem:[%s2431_s1 + $0x40] ss:$8 sm:$0x3]  ;;  %s2113_s1 = smov 88   ;;  %s2117_s11 = smov 112  }
  0x19   :  { %47 = vadd.xlane.f32.xlu0 %v46_v3  ;;  %1968 = vmatprep.subr.bf16.mxu0 %v1967_v23  ;;  %v96_v47 = vrot.slane %v2230_v46, %v95_v45  ;;  %s2118_s12 = smov 72   ;;  %s2119_s13 = smov 104  }
  0x1a   :  { %1996 = vmatprep.subr.bf16.mxu1 %v1967_v23 }
  0x1c   :  { %1970 = vmatpush1.bf16.msra.mxu0 %v1969_v26  ;;  %1998 = vmatpush1.bf16.msra.mxu1 %v1969_v26 }
  0x1d   :  { %1853 = vmatprep.subr.mxu1 %v2109_v21  ;;  %1868 = vmatprep.subr.mxu0 %v2109_v21 }
  0xa2   :  { %v45_v4 = vpop.xlane.xlu0 %44 }
  0xa3   :  { %v50_v5 = vmul.f32 0.03125, %v45_v4 }
  0xa5   :  { %v52_v6 = vsub.f32 %v2169_v0, %v50_v5 }
  0xa6   :  { %v48_v7 = vpop.xlane.xlu0 %47 }
  0xa7   :  { %v51_v8 = vmul.f32 0.03125, %v48_v7  ;;  %v54_v9 = vmul.f32 %v52_v6, %v52_v6 }
  0xa9   :  { %v53_v10 = vsub.f32 %v2174_v1, %v51_v8  ;;  %v56_v11 = vsel %vm42_vm0, %v54_v9, 0.0 }
  0xaa   :  { %57 = vadd.xlane.f32.xlu1 %v56_v11 }
  0xab   :  { %v55_v12 = vmul.f32 %v53_v10, %v53_v10 }
  0xad   :  { %v59_v13 = vsel %vm42_vm0, %v55_v12, 0.0 }
  0xae   :  { %60 = vadd.xlane.f32.xlu1 %v59_v13 }
 0x137   :  { %v58_v27 = vpop.xlane.xlu1 %57 }
 0x138   :  { %v62_v28 = vmul.f32 0.03125, %v58_v27 }
 0x13a   :  { %v64_v29 = vadd.f32 1e-05, %v62_v28 }
 0x13b   :  { %v61_v30 = vpop.xlane.xlu1 %60 }
 0x13c   :  { %2014 = vrsqrt.f32 %v64_v29  ;;  %v63_v31 = vmul.f32 0.03125, %v61_v30 }
 0x13e   :  { %v65_v32 = vadd.f32 1e-05, %v63_v31 }
 0x140   :  { %2016 = vrsqrt.f32 %v65_v32 }
 0x146   :  { %v2015_v33 = vpop.eup %2014 }
 0x147   :  { %v68_v35 = vmul.f32 %v2015_v33, %v52_v6 }
 0x149   :  { %v74_v37 = vmul.f32 %v1767_v34, %v68_v35 }
 0x14a   :  { %v2017_v38 = vpop.eup %2016 }
 0x14b   :  { %v80_v39 = vadd.f32 %v1768_v36, %v74_v37  ;;  %v69_v40 = vmul.f32 %v2017_v38, %v53_v10 }
 0x14d   :  { %1770 = vmatmul.mubr.msk.f32.vlgmr.msra.gmra.mrb[0].mxu0 %vm42_vm0, %v80_v39  ;;  %v75_v41 = vmul.f32 %v1767_v34, %v69_v40 }
 0x14e   :  { %1870 = vmatprep.mubr.msk.f32.mxu0 %vm2110_vm1, %v2109_v21 }
 0x14f   :  { %v81_v42 = vadd.f32 %v1768_v36, %v75_v41 }
 0x151   :  { %1771 = vmatmul.mubr.msk.f32.vlgmr.msra.gmra.mrb[0].mxu1 %vm42_vm0, %v81_v42 }
 0x152   :  { %1855 = vmatprep.mubr.msk.f32.mxu1 %vm2110_vm1, %v2109_v21 }
 0x220   :  { %v175_v48 = vpop.f32.mrb[0].mxu0 }
 0x221   :  { %v2233_v49 = vadd.f32 %v175_v48, %v96_v47  ;;  %v2235_v50 = vpop.f32.mrb[1].mxu0  ;;  %v99_v48 = vsub.s32 1, %v2220_v44 }
 0x223   :  { %187 = vrot.lane.b32.xlu0 %v2233_v49, %s2111_s8  ;;  %v100_v44 = vrot.slane %v2230_v46, %v99_v48 }
 0x224   :  { %v181_v51 = vpop.f32.mrb[0].mxu1 }
 0x225   :  { %v2239_v52 = vadd.f32 %v181_v51, %v96_v47  ;;  %v2241_v53 = vpop.f32.mrb[1].mxu1 }
 0x227   :  { %363 = vrot.lane.b32.xlu0 %v2233_v49, %s2112_s9  ;;  %265 = vrot.lane.b32.xlu1 %v2239_v52, %s2111_s8 }
 0x22b   :  { %365 = vrot.lane.b32.xlu1 %v2233_v49, %s2113_s1 }
 0x22f   :  { %443 = vrot.lane.b32.xlu1 %v2239_v52, %s2113_s1 }
 0x233   :  { %441 = vrot.lane.b32.xlu1 %v2239_v52, %s2112_s9 }
 0x295   :  { %v188_v54 = vpop.permute.xlu0 %187 }
 0x296   :  { %1854 = vmatpush3.xpose.msk.msra.mxu1 %vm189_vm2, %v188_v54 }
 0x297   :  { %1858 = vmatprep.subr.mxu1 %v2109_v21 }
 0x299   :  { %v266_v55 = vpop.permute.xlu1 %265  ;;  %1856 = vmatmul.mubr.msk.f32.vlgmr.msra.gmra.mrb[2].mxu1 %vm189_vm2, %v2233_v49  ;;  %v364_v57 = vpop.permute.xlu0 %363 }
 0x29a   :  { %1859 = vmatpush3.xpose.msk.msra.mxu1 %vm189_vm2, %v266_v55  ;;  %1860 = vmatprep.mubr.msk.f32.mxu1 %vm2110_vm1, %v2109_v21 }
 0x29b   :  { %1863 = vmatprep.subr.mxu1 %v2109_v21 }
 0x29d   :  { %v366_v56 = vpop.permute.xlu1 %365  ;;  %1861 = vmatmul.mubr.msk.f32.vlgmr.msra.gmra.mrb[4].mxu1 %vm189_vm2, %v2239_v52 }
 0x29e   :  { %1864 = vmatpush3.xpose.msk.msra.mxu1 %vm189_vm2, %v366_v56  ;;  %1865 = vmatprep.mubr.msk.f32.mxu1 %vm2110_vm1, %v2109_v21  ;;  %v2309_v56 = vadd.f32 %v2241_v53, %v100_v44 }
 0x29f   :  { %1873 = vmatprep.subr.mxu1 %v2109_v21 }
 0x2a1   :  { %v444_v58 = vpop.permute.xlu1 %443  ;;  %1866 = vmatmul.mubr.msk.f32.vlgmr.msra.gmra.mrb[6].mxu1 %vm189_vm2, %v364_v57 }
 0x2a2   :  { %1869 = vmatpush3.xpose.msk.msra.mxu0 %vm189_vm2, %v444_v58  ;;  %1875 = vmatprep.mubr.msk.f32.mxu1 %vm2110_vm1, %v2109_v21  ;;  %v2313_v58 = vadd.f32 %v2235_v50, %v100_v44 }
 0x2a3   :  { %1878 = vmatprep.subr.mxu0 %v2109_v21 }
 0x2a5   :  { %v442_v59 = vpop.permute.xlu1 %441 }
 0x2a6   :  { %1871 = vmatmul.mubr.msk.f32.vlgmr.msra.gmra.mrb[2].mxu0 %vm189_vm2, %v442_v59 }
 0x2a7   :  { %1880 = vmatprep.mubr.msk.f32.mxu0 %vm2110_vm1, %v2109_v21 }
 0x36c   :  { %v260_v60 = vpop.f32.mrb[2].mxu1 }
 0x36d   :  { %v1857_v61 = vpop.f32.mrb[3].mxu1  ;;  %v341_v6 = vsel %vm189_vm2, %v260_v60, -inf }
 0x370   :  { %v337_v62 = vpop.f32.mrb[4].mxu1 }
 0x371   :  { %v1862_v63 = vpop.f32.mrb[5].mxu1  ;;  %v344_v9 = vsel %vm189_vm2, %v337_v62, -inf }
 0x374   :  { %v437_v2 = vpop.f32.mrb[6].mxu1 }
 0x375   :  { %v1867_v3 = vpop.f32.mrb[7].mxu1  ;;  %v519_v4 = vsel %vm189_vm2, %v437_v2, -inf }
 0x376   :  { %520 = vmax.xlane.f32.xlu0 %v519_v4 }
 0x379   :  { %v515_v5 = vpop.f32.mrb[2].mxu0 }
 0x37a   :  { %v1872_v7 = vpop.f32.mrb[3].mxu0  ;;  %342 = vmax.xlane.f32.xlu0 %v341_v6  ;;  %v522_v8 = vsel %vm189_vm2, %v515_v5, -inf }
 0x37b   :  { %523 = vmax.xlane.f32.xlu1 %v522_v8 }
 0x37e   :  { %345 = vmax.xlane.f32.xlu0 %v344_v9 }
 0x403   :  { %v521_v10 = vpop.xlane.xlu0 %520 }
 0x404   :  { %v525_v11 = vsub.f32 %v437_v2, %v521_v10 }
 0x406   :  { %v527_v16 = vmul.f32 1.442695, %v525_v11 }
 0x407   :  { %v343_v12 = vpop.xlane.xlu0 %342 }
 0x408   :  { %v347_v13 = vsub.f32 %v260_v60, %v343_v12  ;;  %v524_v14 = vpop.xlane.xlu1 %523 }
 0x409   :  { %v526_v15 = vsub.f32 %v515_v5, %v524_v14 }
 0x40a   :  { %v349_v17 = vmul.f32 1.442695, %v347_v13 }
 0x40b   :  { %v529_v18 = vmul.f32 1.442695, %v526_v15  ;;  %v346_v19 = vpop.xlane.xlu0 %345 }
 0x40c   :  { %2018 = vpow2.f32 %v349_v17  ;;  %v348_v20 = vsub.f32 %v337_v62, %v346_v19 }
 0x40d   :  { %2020 = vpow2.f32 %v529_v18 }
 0x40e   :  { %2022 = vpow2.f32 %v527_v16  ;;  %v351_v22 = vmul.f32 1.442695, %v348_v20 }
 0x410   :  { %2024 = vpow2.f32 %v351_v22 }
 0x416   :  { %v2019_v23 = vpop.eup %2018 }
 0x417   :  { %v2021_v24 = vpop.eup %2020  ;;  %v353_v25 = vsel %vm189_vm2, %v2019_v23, 0.0 }
 0x418   :  { %v2023_v26 = vpop.eup %2022  ;;  %354 = vadd.xlane.f32.xlu0 %v353_v25  ;;  %v534_v27 = vsel %vm189_vm2, %v2021_v24, 0.0 }
 0x419   :  { %535 = vadd.xlane.f32.xlu1 %v534_v27  ;;  %v531_v29 = vsel %vm189_vm2, %v2023_v26, 0.0 }
 0x41a   :  { %v2025_v28 = vpop.eup %2024 }
 0x41b   :  { %v356_v30 = vsel %vm189_vm2, %v2025_v28, 0.0 }
 0x41c   :  { %532 = vadd.xlane.f32.xlu0 %v531_v29 }
 0x41d   :  { %357 = vadd.xlane.f32.xlu1 %v356_v30 }
 0x42e   :  { %617 = vrot.lane.b32.xlu1 %v2239_v52, %s2114_s10 }
 0x432   :  { %541 = vrot.lane.b32.xlu0 %v2233_v49, %s2114_s10  ;;  %693 = vrot.lane.b32.xlu1 %v2233_v49, %s2115_s0 }
 0x436   :  { %847 = vrot.lane.b32.xlu0 %v2233_v49, %s2116_s3  ;;  %769 = vrot.lane.b32.xlu1 %v2239_v52, %s2115_s0 }
 0x43a   :  { %845 = vrot.lane.b32.xlu0 %v2233_v49, %s2117_s11  ;;  %925 = vrot.lane.b32.xlu1 %v2239_v52, %s2116_s3 }
 0x43e   :  { %923 = vrot.lane.b32.xlu1 %v2239_v52, %s2117_s11  ;;  %s2120_s11 = smov [#allocation5]  }
 0x4a5   :  { %v355_v31 = vpop.xlane.xlu0 %354 }
 0x4a6   :  { %v536_v32 = vpop.xlane.xlu1 %535 }
 0x4a7   :  { %2026 = vrcp.f32 %v536_v32 }
 0x4a9   :  { %v533_v33 = vpop.xlane.xlu0 %532 }
 0x4aa   :  { %2028 = vrcp.f32 %v533_v33  ;;  %v358_v34 = vpop.xlane.xlu1 %357 }
 0x4ab   :  { %2030 = vrcp.f32 %v358_v34 }
 0x4ac   :  { %2032 = vrcp.f32 %v355_v31 }
 0x4ad   :  { %v542_v35 = vpop.permute.xlu0 %541 }
 0x4ae   :  { %v618_v36 = vpop.permute.xlu1 %617  ;;  %1874 = vmatpush3.msra.mxu1 %v542_v35 }
 0x4af   :  { %1879 = vmatpush3.msra.mxu0 %v618_v36  ;;  %1883 = vmatprep.subr.mxu1 %v2109_v21 }
 0x4b0   :  { %1888 = vmatprep.subr.mxu0 %v2109_v21 }
 0x4b1   :  { %v2027_v37 = vpop.eup %2026  ;;  %v848_v55 = vpop.permute.xlu0 %847 }
 0x4b2   :  { %v540_v38 = vmul.f32 %v2027_v37, %v2021_v24  ;;  %v694_v39 = vpop.permute.xlu1 %693 }
 0x4b4   :  { %v2029_v40 = vpop.eup %2028  ;;  %1881 = vmatmul.mubr.msk.f32.vlgmr.msra.gmra.mrb[4].mxu0 %vm189_vm2, %v540_v38 }
 0x4b5   :  { %v2031_v41 = vpop.eup %2030  ;;  %v539_v42 = vmul.f32 %v2029_v40, %v2023_v26  ;;  %1890 = vmatprep.mubr.msk.f32.mxu0 %vm2110_vm1, %v2109_v21  ;;  %v846_v59 = vpop.permute.xlu0 %845 }
 0x4b6   :  { %v2033_v43 = vpop.eup %2032  ;;  %v362_v45 = vmul.f32 %v2031_v41, %v2025_v28  ;;  %v770_v47 = vpop.permute.xlu1 %769 }
 0x4b7   :  { %1876 = vmatmul.mubr.msk.f32.vlgmr.msra.gmra.mrb[8].mxu1 %vm189_vm2, %v539_v42  ;;  %1889 = vmatpush3.msra.mxu0 %v770_v47  ;;  %v361_v51 = vmul.f32 %v2033_v43, %v2019_v23 }
 0x4b8   :  { %1884 = vmatpush3.msra.mxu1 %v694_v39  ;;  %1891 = vmatmul.mubr.msk.f32.vlgmr.msra.gmra.mrb[6].mxu0 %vm189_vm2, %v362_v45 }
 0x4b9   :  { %1885 = vmatprep.mubr.msk.f32.mxu1 %vm2110_vm1, %v2109_v21  ;;  %1893 = vmatprep.subr.mxu1 %v2109_v21 }
 0x4ba   :  { %v926_v54 = vpop.permute.xlu1 %925  ;;  %1898 = vmatprep.subr.mxu0 %v2109_v21  ;;  %1900 = vmatprep.mubr.msk.f32.mxu0 %vm2110_vm1, %v2109_v21 }
 0x4bb   :  { %1886 = vmatmul.mubr.msk.f32.vlgmr.msra.gmra.mrb[10].mxu1 %vm189_vm2, %v361_v51 }
 0x4bc   :  { %1895 = vmatprep.mubr.msk.f32.mxu1 %vm2110_vm1, %v2109_v21 }
 0x4be   :  { %1899 = vmatpush3.xpose.msk.msra.mxu0 %vm189_vm2, %v926_v54  ;;  %v924_v57 = vpop.permute.xlu1 %923 }
 0x4bf   :  { %1894 = vmatpush3.xpose.msk.msra.mxu1 %vm189_vm2, %v848_v55  ;;  %1908 = vmatprep.subr.mxu0 %v2109_v21 }
 0x4c0   :  { %1903 = vmatprep.subr.mxu1 %v2109_v21 }
 0x4c1   :  { %1901 = vmatmul.mubr.msk.f32.vlgmr.msra.gmra.mrb[8].mxu0 %vm189_vm2, %v924_v57 }
 0x4c2   :  { %1896 = vmatmul.mubr.msk.f32.vlgmr.msra.gmra.mrb[12].mxu1 %vm189_vm2, %v846_v59  ;;  %1909 = vmatpush3.msra.mxu0 %v2309_v56 }
 0x4c3   :  { %1904 = vmatpush3.msra.mxu1 %v2313_v58  ;;  %1910 = vmatprep.mubr.msk.f32.mxu0 %vm2110_vm1, %v2109_v21 }
 0x4c4   :  { %1918 = vmatprep.subr.mxu0 %v2109_v21  ;;  %1905 = vmatprep.mubr.msk.f32.mxu1 %vm2110_vm1, %v2109_v21 }
 0x4c5   :  { %1913 = vmatprep.subr.mxu1 %v2109_v21 }
 0x587   :  { %v689_v46 = vpop.f32.mrb[4].mxu0 }
 0x588   :  { %v1882_v50 = vpop.f32.mrb[5].mxu0 }
 0x58a   :  { %v613_v53 = vpop.f32.mrb[8].mxu1 }
 0x58b   :  { %v1877_v60 = vpop.f32.mrb[9].mxu1  ;;  %v841_v61 = vpop.f32.mrb[6].mxu0 }
 0x58c   :  { %v842_v62 = vadd.f32 %v841_v61, %v689_v46  ;;  %v1892_v63 = vpop.f32.mrb[7].mxu0 }
 0x58e   :  { %v765_v2 = vpop.f32.mrb[10].mxu1 }
 0x58f   :  { %v766_v3 = vadd.f32 %v765_v2, %v613_v53  ;;  %v1887_v4 = vpop.f32.mrb[11].mxu1 }
 0x594   :  { %v997_v5 = vpop.f32.mrb[8].mxu0 }
 0x595   :  { %v919_v6 = vpop.f32.mrb[12].mxu1  ;;  %v1902_v7 = vpop.f32.mrb[9].mxu0  ;;  %v1004_v8 = vsel %vm189_vm2, %v997_v5, -inf }
 0x596   :  { %v1897_v9 = vpop.f32.mrb[13].mxu1  ;;  %1005 = vmax.xlane.f32.xlu1 %v1004_v8  ;;  %v1001_v10 = vsel %vm189_vm2, %v919_v6, -inf }
 0x597   :  { %1002 = vmax.xlane.f32.xlu0 %v1001_v10 }
 0x5a7   :  { %1251 = vrot.lane.b32.xlu1 %v2239_v52, %s2118_s12 }
 0x5ab   :  { %1171 = vrot.lane.b32.xlu1 %v2233_v49, %s2119_s13 }
 0x5af   :  { %1249 = vrot.lane.b32.xlu1 %v2239_v52, %s2119_s13 }
 0x623   :  { %v1006_v11 = vpop.xlane.xlu1 %1005 }
 0x624   :  { %v1008_v12 = vsub.f32 %v997_v5, %v1006_v11  ;;  %v1003_v13 = vpop.xlane.xlu0 %1002 }
 0x625   :  { %v1007_v14 = vsub.f32 %v919_v6, %v1003_v13 }
 0x626   :  { %v1011_v15 = vmul.f32 1.442695, %v1008_v12 }
 0x627   :  { %v1009_v16 = vmul.f32 1.442695, %v1007_v14  ;;  %v1252_v23 = vpop.permute.xlu1 %1251 }
 0x628   :  { %2034 = vpow2.f32 %v1011_v15 }
 0x629   :  { %2036 = vpow2.f32 %v1009_v16 }
 0x62b   :  { %v1172_v25 = vpop.permute.xlu1 %1171 }
 0x632   :  { %v2035_v17 = vpop.eup %2034 }
 0x633   :  { %v1016_v18 = vsel %vm189_vm2, %v2035_v17, 0.0  ;;  %v2037_v19 = vpop.eup %2036 }
 0x634   :  { %1017 = vadd.xlane.f32.xlu0 %v1016_v18  ;;  %v1013_v20 = vsel %vm189_vm2, %v2037_v19, 0.0 }
 0x638   :  { %1014 = vadd.xlane.f32.xlu0 %v1013_v20  ;;  %v1551_v20 = vld [vmem:[#allocation2] sm:$0xff] }
 0x64e   :  { %1173 = vrot.lane.b32.xlu0 %v2233_v49, %s2118_s12  ;;  %v1250_v49 = vpop.permute.xlu1 %1249  ;;  %s1755_s12 = sshll.u32 %s2120_s11, 4  ;;  %s1756_s12 = int_to_ptr.vmem [resolvable:$true] %s1755_s12 }
 0x64f   :  { %s2080_s13 = scalar_lea.vmem %s1756_s12, 256  ;;  %p2085_p9 = scmp.lt.s32.totalorder %s1756_s12, %s1756_s12 }
 0x650   :  { %p2081_p8 = scmp.ne.s32.totalorder %s1756_s12, %s2080_s13  ;;  %p2086_p10 = scmp.lt.s32.totalorder %s2080_s13, %s2080_s13 }
 0x652   :  { %p2087_p11 = por %p2086_p10, %p2085_p9 }
 0x654   :  { %p2088_p12 = pnand %p2087_p11, %p2081_p8 }
 0x6c1   :  { %v1018_v22 = vpop.xlane.xlu0 %1017 }
 0x6c2   :  { %2038 = vrcp.f32 %v1018_v22  ;;  %v1552_v22 = vld [vmem:[#allocation2 + $0x8] sm:$0xff] }
 0x6c5   :  { %v1015_v52 = vpop.xlane.xlu0 %1014 }
 0x6c6   :  { %2040 = vrcp.f32 %v1015_v52  ;;  %v1553_v52 = vld [vmem:[#allocation2 + $0x10] sm:$0xff] }
 0x6c9   :  { %v1174_v29 = vpop.permute.xlu0 %1173 }
 0x6cc   :  { %v2039_v24 = vpop.eup %2038 }
 0x6cd   :  { %v1022_v26 = vmul.f32 %v2039_v24, %v2035_v17  ;;  %v1554_v24 = vld [vmem:[#allocation2 + $0x18] sm:$0xff] }
 0x6cf   :  { %1911 = vmatmul.mubr.msk.f32.vlgmr.msra.gmra.mrb[10].mxu0 %vm189_vm2, %v1022_v26 }
 0x6d0   :  { %v2041_v27 = vpop.eup %2040  ;;  %1919 = vmatpush3.xpose.msk.msra.mxu0 %vm189_vm2, %v1252_v23  ;;  %1920 = vmatprep.mubr.msk.f32.mxu0 %vm2110_vm1, %v2109_v21  ;;  %v1971_v23 = vpack.c.bf16 %v1552_v22, %v1551_v20 }
 0x6d1   :  { %v1021_v28 = vmul.f32 %v2041_v27, %v2037_v19  ;;  %1928 = vmatprep.subr.mxu0 %v2109_v21 }
 0x6d3   :  { %1906 = vmatmul.mubr.msk.f32.vlgmr.msra.gmra.mrb[14].mxu1 %vm189_vm2, %v1021_v28  ;;  %1921 = vmatmul.mubr.msk.f32.vlgmr.msra.gmra.mrb[12].mxu0 %vm189_vm2, %v1250_v49 }
 0x6d4   :  { %1914 = vmatpush3.xpose.msk.msra.mxu1 %vm189_vm2, %v1174_v29  ;;  %1915 = vmatprep.mubr.msk.f32.mxu1 %vm2110_vm1, %v2109_v21 }
 0x6d5   :  { %1923 = vmatprep.subr.mxu1 %v2109_v21  ;;  %1930 = vmatprep.mubr.msk.f32.mxu0 %vm2110_vm1, %v2109_v21 }
 0x6d7   :  { %1916 = vmatmul.mubr.msk.f32.vlgmr.msra.gmra.mrb[16].mxu1 %vm189_vm2, %v1172_v25  ;;  %v1975_v25 = vpack.c.bf16 %v1554_v24, %v1553_v52 }
 0x6d8   :  { %1925 = vmatprep.mubr.msk.f32.mxu1 %vm2110_vm1, %v2109_v21 }
 0x7a2   :  { %v1165_v30 = vpop.f32.mrb[10].mxu0 }
 0x7a3   :  { %v1170_v31 = vadd.f32 %v1165_v30, %v842_v62  ;;  %v1912_v32 = vpop.f32.mrb[11].mxu0 }
 0x7a6   :  { %v1092_v33 = vpop.f32.mrb[14].mxu1  ;;  %v1323_v34 = vpop.f32.mrb[12].mxu0 }
 0x7a7   :  { %v1169_v35 = vadd.f32 %v1092_v33, %v766_v3  ;;  %v1907_v36 = vpop.f32.mrb[15].mxu1  ;;  %v1922_v37 = vpop.f32.mrb[13].mxu0  ;;  %v1330_v38 = vsel %vm189_vm2, %v1323_v34, -inf  ;;  %v1797_v33 = vld [vmem:[%s2432_s2 + $0x2] ss:$0 sm:$0xff] }
 0x7a8   :  { %1331 = vmax.xlane.f32.xlu1 %v1330_v38  ;;  %v1798_v37 = vld [vmem:[%s2432_s2 + $0x3] ss:$0 sm:$0xff] }
 0x7aa   :  { %v1245_v39 = vpop.f32.mrb[16].mxu1 }
 0x7ab   :  { %v1917_v40 = vpop.f32.mrb[17].mxu1  ;;  %v1327_v41 = vsel %vm189_vm2, %v1245_v39, -inf }
 0x7ac   :  { %1328 = vmax.xlane.f32.xlu0 %v1327_v41  ;;  %v1651_v41 = vld [vmem:[%s2434_s4] sm:$0xff] }
 0x7b9   :  { %1427 = vrot.lane.b32.xlu1 %v2309_v56, %s2111_s8 }
 0x835   :  { %v1332_v21 = vpop.xlane.xlu1 %1331 }
 0x836   :  { %v1334_v42 = vsub.f32 %v1323_v34, %v1332_v21  ;;  %v1652_v21 = vld [vmem:[%s2434_s4 + $0x8] sm:$0xff] }
 0x838   :  { %v1337_v43 = vmul.f32 1.442695, %v1334_v42  ;;  %v1979_v42 = vpack.c.bf16 %v1652_v21, %v1651_v41 }
 0x839   :  { %v1428_v45 = vpop.permute.xlu1 %1427  ;;  %v1329_v47 = vpop.xlane.xlu0 %1328 }
 0x83a   :  { %2042 = vpow2.f32 %v1337_v43  ;;  %v1333_v48 = vsub.f32 %v1245_v39, %v1329_v47  ;;  %1929 = vmatpush3.msra.mxu0 %v1428_v45  ;;  %v1653_v43 = vld [vmem:[%s2434_s4 + $0x10] sm:$0xff]  ;;  %v1654_v45 = vld [vmem:[%s2434_s4 + $0x18] sm:$0xff] }
 0x83b   :  { %1980 = vmatprep.subr.bf16.mxu0 %v1979_v42  ;;  %v1983_v47 = vpack.c.bf16 %v1654_v45, %v1653_v43 }
 0x83c   :  { %v1335_v51 = vmul.f32 1.442695, %v1333_v48  ;;  %v1655_v48 = vld [vmem:[%s2434_s4 + $0x20] sm:$0xff] }
 0x83e   :  { %2044 = vpow2.f32 %v1335_v51  ;;  %v1656_v51 = vld [vmem:[%s2434_s4 + $0x28] sm:$0xff] }
 0x844   :  { %v2043_v54 = vpop.eup %2042 }
 0x845   :  { %v1342_v55 = vsel %vm189_vm2, %v2043_v54, 0.0 }
 0x846   :  { %1343 = vadd.xlane.f32.xlu0 %v1342_v55  ;;  %v1657_v55 = vld [vmem:[%s2434_s4 + $0x30] sm:$0xff] }
 0x848   :  { %v2045_v44 = vpop.eup %2044 }
 0x849   :  { %v1339_v57 = vsel %vm189_vm2, %v2045_v44, 0.0 }
 0x84a   :  { %1340 = vadd.xlane.f32.xlu0 %v1339_v57 }
 0x860   :  { %1350 = vrot.lane.b32.xlu0 %v2313_v58, %s2111_s8  ;;  %v1796_v58 = vld [vmem:[%s2432_s2 + $0x4] ss:$0 sm:$0xff] }
 0x8d3   :  { %v1344_v56 = vpop.xlane.xlu0 %1343 }
 0x8d4   :  { %2046 = vrcp.f32 %v1344_v56  ;;  %v1799_v56 = vld [vmem:[#allocation2 + $0x20] ss:$0 sm:$0xff] }
 0x8d7   :  { %v1341_v59 = vpop.xlane.xlu0 %1340 }
 0x8d8   :  { %2048 = vrcp.f32 %v1341_v59 }
 0x8db   :  { %v1351_v46 = vpop.permute.xlu0 %1350 }
 0x8dc   :  { %1924 = vmatpush3.msra.mxu1 %v1351_v46 }
 0x8dd   :  { %1972 = vmatprep.subr.bf16.mxu1 %v1971_v23 }
 0x8de   :  { %v2047_v50 = vpop.eup %2046 }
 0x8df   :  { %v1348_v53 = vmul.f32 %v2047_v50, %v2043_v54  ;;  %v1987_v54 = vpack.c.bf16 %v1656_v51, %v1655_v48 }
 0x8e1   :  { %1931 = vmatmul.mubr.msk.f32.vlgmr.msra.gmra.mrb[14].mxu0 %vm189_vm2, %v1348_v53 }
 0x8e2   :  { %v2049_v60 = vpop.eup %2048  ;;  %1982 = vmatpush3.bf16.msra.mxu0 %v1979_v42 }
 0x8e3   :  { %v1347_v61 = vmul.f32 %v2049_v60, %v2045_v44  ;;  %1984 = vmatprep.subr.bf16.mxu0 %v1983_v47  ;;  %v1658_v44 = vld [vmem:[%s2434_s4 + $0x38] sm:$0xff] }
 0x8e4   :  { %v1991_v57 = vpack.c.bf16 %v1658_v44, %v1657_v55 }
 0x8e5   :  { %1926 = vmatmul.mubr.msk.f32.vlgmr.msra.gmra.mrb[18].mxu1 %vm189_vm2, %v1347_v61 }
 0x8e6   :  { %1974 = vmatpush3.bf16.msra.mxu1 %v1971_v23  ;;  %1986 = vmatpush3.bf16.msra.mxu0 %v1983_v47 }
 0x8e7   :  { %1976 = vmatprep.subr.bf16.mxu1 %v1975_v25  ;;  %1988 = vmatprep.subr.bf16.mxu0 %v1987_v54 }
 0x8ea   :  { %1978 = vmatpush3.bf16.msra.mxu1 %v1975_v25  ;;  %1990 = vmatpush3.bf16.msra.mxu0 %v1987_v54 }
 0x8eb   :  { %1992 = vmatprep.subr.bf16.mxu0 %v1991_v57 }
 0x8ee   :  { %1994 = vmatpush3.bf16.msra.mxu0 %v1991_v57 }
 0x9b4   :  { %v1499_v62 = vpop.f32.mrb[14].mxu0 }
 0x9b5   :  { %v1504_v63 = vadd.f32 %v1499_v62, %v1170_v31  ;;  %v1932_v2 = vpop.f32.mrb[15].mxu0 }
 0x9b7   :  { %v1506_v3 = vadd.f32 %v1504_v63, %v2174_v1 }
 0x9b8   :  { %v1422_v4 = vpop.f32.mrb[18].mxu1 }
 0x9b9   :  { %v2363_v5 = vadd.f32 %v1796_v58, %v1506_v3  ;;  %v1503_v6 = vadd.f32 %v1422_v4, %v1169_v35  ;;  %v1927_v7 = vpop.f32.mrb[19].mxu1 }
 0x9bb   :  { %v1505_v8 = vadd.f32 %v1503_v6, %v2169_v0  ;;  %v1516_v9 = vsel %vm42_vm0, %v2363_v5, 0.0 }
 0x9bc   :  { %1517 = vadd.xlane.f32.xlu0 %v1516_v9 }
 0x9bd   :  { %v2368_v10 = vadd.f32 %v1796_v58, %v1505_v8  ;;  %v1802_v8 = vld [vmem:[%s2434_s4 + $0x40] ss:$0 sm:$0xff] }
 0x9bf   :  { %v1513_v11 = vsel %vm42_vm0, %v2368_v10, 0.0 }
 0x9c0   :  { %1514 = vadd.xlane.f32.xlu1 %v1513_v11 }
 0xa49   :  { %v1518_v12 = vpop.xlane.xlu0 %1517 }
 0xa4a   :  { %v1520_v13 = vmul.f32 0.03125, %v1518_v12 }
 0xa4c   :  { %v1522_v1 = vsub.f32 %v2363_v5, %v1520_v13 }
 0xa4d   :  { %v1515_v14 = vpop.xlane.xlu1 %1514 }
 0xa4e   :  { %v1519_v15 = vmul.f32 0.03125, %v1515_v14  ;;  %v1524_v16 = vmul.f32 %v1522_v1, %v1522_v1 }
 0xa50   :  { %v1521_v17 = vsub.f32 %v2368_v10, %v1519_v15  ;;  %v1528_v0 = vsel %vm42_vm0, %v1524_v16, 0.0 }
 0xa51   :  { %1529 = vadd.xlane.f32.xlu1 %v1528_v0 }
 0xa52   :  { %v1523_v18 = vmul.f32 %v1521_v17, %v1521_v17 }
 0xa54   :  { %v1525_v19 = vsel %vm42_vm0, %v1523_v18, 0.0 }
 0xa55   :  { %1526 = vadd.xlane.f32.xlu0 %v1525_v19 }
 0xade   :  { %v1530_v26 = vpop.xlane.xlu1 %1529 }
 0xadf   :  { %v1532_v27 = vmul.f32 0.03125, %v1530_v26 }
 0xae1   :  { %v1534_v28 = vadd.f32 1e-05, %v1532_v27 }
 0xae2   :  { %v1527_v49 = vpop.xlane.xlu0 %1526 }
 0xae3   :  { %2050 = vrsqrt.f32 %v1534_v28  ;;  %v1531_v29 = vmul.f32 0.03125, %v1527_v49 }
 0xae5   :  { %v1533_v30 = vadd.f32 1e-05, %v1531_v29 }
 0xae7   :  { %2052 = vrsqrt.f32 %v1533_v30 }
 0xaed   :  { %v2051_v31 = vpop.eup %2050 }
 0xaee   :  { %v1538_v32 = vmul.f32 %v2051_v31, %v1522_v1 }
 0xaf0   :  { %v1544_v36 = vmul.f32 %v1797_v33, %v1538_v32 }
 0xaf1   :  { %v2053_v34 = vpop.eup %2052 }
 0xaf2   :  { %v1537_v35 = vmul.f32 %v2053_v34, %v1521_v17  ;;  %v1550_v40 = vadd.f32 %v1798_v37, %v1544_v36 }
 0xaf4   :  { %v1543_v38 = vmul.f32 %v1797_v33, %v1537_v35 }
 0xaf6   :  { %v1549_v39 = vadd.f32 %v1798_v37, %v1543_v38 }
 0xaf8   :  { %1941 = vmatprep.mubr.msk.f32.mxu1 %vm42_vm0, %v1549_v39 }
 0xaf9   :  { %1942 = vmatmul.mubr.msk.f32.vlgmr.msra.gmra.mrb[20].mxu1 %vm42_vm0, %v1550_v40 }
 0xbcc   :  { %v1943_v59 = vpop.f32.mrb[20].mxu1 }
 0xbcd   :  { %v1638_v46 = vadd.f32 %v1943_v59, %v1799_v56  ;;  %v1632_v50 = vpop.f32.mrb[21].mxu1 }
 0xbce   :  { %v1633_v53 = vadd.f32 %v1799_v56, %v1632_v50 }
 0xbcf   :  { %v1644_v60 = vmul.f32 0.70710677, %v1638_v46  ;;  %v1642_v4 = vmul.f32 0.5, %v1638_v46 }
 0xbd0   :  { %v1643_v61 = vmul.f32 0.70710677, %v1633_v53  ;;  %v1641_v58 = vmul.f32 0.5, %v1633_v53 }
 0xbd1   :  { %2054 = verf.f32 %v1644_v60 }
 0xbd2   :  { %2056 = verf.f32 %v1643_v61 }
 0xbdb   :  { %v2055_v62 = vpop.eup %2054 }
 0xbdc   :  { %v2057_v63 = vpop.eup %2056  ;;  %v1648_v2 = vadd.f32 1.0, %v2055_v62 }
 0xbdd   :  { %v1647_v3 = vadd.f32 1.0, %v2057_v63 }
 0xbde   :  { %v1650_v7 = vmul.f32 %v1648_v2, %v1642_v4 }
 0xbdf   :  { %v1649_v6 = vmul.f32 %v1647_v3, %v1641_v58 }
 0xbe1   :  { %1960 = vmatprep.mubr.msk.f32.mxu0 %vm1664_vm3, %v1649_v6 }
 0xbe2   :  { %1961 = vmatmul.mubr.msk.f32.vlgmr.msra.gmra.mrb[16].mxu0 %vm1664_vm3, %v1650_v7 }
 0xcb5   :  { %v1962_v9 = vpop.f32.mrb[16].mxu0 }
 0xcb6   :  { %v1743_v11 = vadd.f32 %v1962_v9, %v1802_v8  ;;  %v1737_v12 = vpop.f32.mrb[17].mxu0 }
 0xcb7   :  { %v1738_v13 = vadd.f32 %v1802_v8, %v1737_v12 }
 0xcb8   :  { %v1747_v1 = vadd.f32 %v1743_v11, %v2363_v5 }
 0xcb9   :  { %v1746_v14 = vadd.f32 %v1738_v13, %v2368_v10 }
 0xcba   :  { %1749 = vst.msk [vmem:[#allocation5 + $0x8] sm:$0xff] %vm42_vm0, %v1747_v1 }
 0xcbb   :  { %1748 = vst.msk [vmem:[#allocation5] sm:$0xff] %vm42_vm0, %v1746_v14 }
 0xcbc   :  { %2091 = shalt.err (!%p2088_p12)
}
 0xcbd   :  { %s2092_s15 = scalar_lea.hbm %s2435_s5, 256 }
 0xcbe   :  { %p2093_p13 = scmp.ne.s32.totalorder %s2435_s5, %s2092_s15  ;;  %p2096_p0 = scmp.lt.u32.totalorder %s2092_s15, %s2435_s5 }
 0xcc0   :  { %p2098_p1 = pnand %p2096_p0, %p2093_p13 }
 0xcc2   :  { %2101 = shalt.err (!%p2098_p1)
}
 0xcc3   :  { %1761 = dma.vmem_to_hbm [thread:$0]  %s1756_s12, 256, %s2435_s5, [#allocation4], %s2107_s28, %s2107_s28, %s2108_s29  }
 0xcc4   :  { %2104 = dma.done.wait [#allocation4], 256  }
 0xcc5   :  { %2105 = vsyncadd [#allocation4], 4294967040 }
 0xcc6   :  { %1765 = vsyncpa [#allocation3], 1 }
 0xcc7   :  { %1766 = vsyncpa [#allocation4], 1 }

</bundles_post_ra>
